<compile_context>
chip_gen: v6e
topology: v6e:2x2x1
jax: 0.10.0
libtpu: 0.0.40
codegen_flags: <defaults>
</compile_context>

<pallas_src>
import jax
import jax.numpy as jnp
from jax.experimental import pallas as pl
from jax.experimental.pallas import tpu as pltpu


# ---------------------------------------------------------------------------
# Kernels
# ---------------------------------------------------------------------------

def _scalar_smem_kernel(const_ref, out_ref):
    # Identity on the SMEM scalar path: one sld + one sst.
    # No grid, no VMEM tile, no vector pipeline.
    out_ref[0] = const_ref[0]


def _scale_consumer_kernel(scale_ref, x_ref, o_ref):
    # How the scalar should be consumed in practice: it rides along as a
    # (1,) SMEM input of the *consumer* kernel and is read once on the
    # scalar path (no broadcast materialized in HBM, no extra launch).
    o_ref[...] = x_ref[...] * scale_ref[0]


# ---------------------------------------------------------------------------
# Wrappers
# ---------------------------------------------------------------------------

def scalar_forward(constant_param: jax.Array) -> jax.Array:
    """Hot-path equivalent of Scalar.forward(): return the parameter as-is."""
    return constant_param


def scalar_forward_kernel(constant_param_1d: jax.Array) -> jax.Array:
    """Kernel-boundary variant (grid-less, SMEM-only, output aliases input).

    `constant_param_1d` must be a (1,) float32 array.  Returns a (1,) array;
    callers convert to () once on the wrapper side if needed.
    """
    return pl.pallas_call(
        _scalar_smem_kernel,
        out_shape=jax.ShapeDtypeStruct((1,), jnp.float32),
        in_specs=[pl.BlockSpec(memory_space=pltpu.MemorySpace.SMEM)],
        out_specs=pl.BlockSpec(memory_space=pltpu.MemorySpace.SMEM),
        input_output_aliases={0: 0},
    )(constant_param_1d)


def scale_by_scalar(constant_param_1d: jax.Array, x: jax.Array) -> jax.Array:
    """Demo consumer kernel: fold the learnable scalar into its consumer.

    One launch total; the scalar stays on the SMEM scalar path inside the
    consumer instead of paying a standalone scalar-kernel launch first.
    """
    return pl.pallas_call(
        _scale_consumer_kernel,
        out_shape=jax.ShapeDtypeStruct(x.shape, x.dtype),
        in_specs=[
            pl.BlockSpec(memory_space=pltpu.MemorySpace.SMEM),   # scalar -> SMEM
            pl.BlockSpec(memory_space=pltpu.MemorySpace.VMEM),   # data   -> VMEM
        ],
        out_specs=pl.BlockSpec(memory_space=pltpu.MemorySpace.VMEM),
    )(constant_param_1d, x)


class ScalarPallas:
    """Mirror of the PyTorch `Scalar` module with a deterministic init."""

    def __init__(self, init_value: float):
        # nn.Parameter(torch.tensor(init_value, dtype=torch.float32))
        # Layout plumbing hoisted out of the hot path: store both the 0-d
        # scalar (for direct return) and a (1,) SMEM-friendly view once.
        self.constant = jnp.asarray(init_value, dtype=jnp.float32)   # shape ()
        self._constant_1d = self.constant.reshape(1)                 # shape (1,)

    def __call__(self) -> jax.Array:
        # forward() is the identity on the parameter -> no kernel launch.
        return scalar_forward(self.constant)

    def call_via_kernel(self) -> jax.Array:
        # Same semantics through an explicit Pallas kernel boundary.
        out_1d = scalar_forward_kernel(self._constant_1d)
        return out_1d[0]   # ()-shape conversion done exactly once, wrapper-side


if __name__ == "__main__":
    # Deterministic parameter init (shape () per the module __init__).
    key = jax.random.PRNGKey(0)
    init_value = float(jax.random.normal(key, ()))

    module = ScalarPallas(init_value)

    # Hot path: direct parameter return (recommended usage).
    out_fast = jax.block_until_ready(module())

    # Kernel-boundary path: grid-less SMEM identity kernel.
    out_kernel = jax.block_until_ready(module.call_via_kernel())

    # Recommended consumer pattern: fold the scalar into a consumer kernel.
    x = jax.random.normal(jax.random.PRNGKey(1), (8, 128), dtype=jnp.float32)
    y = jax.block_until_ready(scale_by_scalar(module._constant_1d, x))

    # Correctness: forward() is the identity on the parameter.
    assert out_fast.shape == () and out_fast.dtype == jnp.float32
    assert jnp.allclose(out_fast, jnp.float32(init_value))

    assert out_kernel.shape == () and out_kernel.dtype == jnp.float32
    assert jnp.allclose(out_kernel, jnp.float32(init_value))
    assert jnp.allclose(out_kernel, out_fast)

    # Consumer correctness: y == x * constant.
    assert y.shape == x.shape and y.dtype == jnp.float32
    assert jnp.allclose(y, x * jnp.float32(init_value), rtol=1e-6, atol=1e-6)

    print("KERNEL_OK")
</pallas_src>

<mosaic_0001>
module attributes {stable_mosaic.version = 11 : i64} {
  func.func @_scalar_smem_kernel(%arg0: memref<1xf32, #tpu.memory_space<smem>>, %arg1: memref<1xf32, #tpu.memory_space<smem>>) attributes {dimension_semantics = [], scalar_prefetch = 0 : i64, scratch_operands = 0 : i64, tpu.core_type = #tpu.core_type<tc>} {
    %c0 = arith.constant 0 : index
    %0 = memref.load %arg0[%c0] : memref<1xf32, #tpu.memory_space<smem>>
    %c0_0 = arith.constant 0 : index
    %1 = memref.load %arg1[%c0_0] : memref<1xf32, #tpu.memory_space<smem>>
    memref.store %0, %arg1[%c0_0] : memref<1xf32, #tpu.memory_space<smem>>
    return
  }
}

</mosaic_0001>

<bundles_post_ra>
// kernel: tpu_custom_call.1
= control target key start
LH: loop header
LB: loop body
LE: loop exit
PB: predicated region body
PF: predicated region fallthrough
CT: control target
= control target key end

     0   :  { %7 = vsyncpa [#allocation4], 0  ;;  %s37_s8 = smov [#allocation3]   ;;  %s54_s0 = inlined_call_operand.<no memory space> [shape: f32[1], index: 0, kind: input, shape index: {}, may-alias: {0,1}]   ;;  %s55_s1 = inlined_call_operand.hbm [shape: f32[1], index: 1, kind: output, shape index: {}, may-alias: {0,1}]  }
   0x1   :  { %12 = sst [smem:[#allocation3]] %s54_s0 }
   0x2   :  { %20 = dma.smem_to_hbm %s37_s8, 16, %s55_s1, [#allocation4]  }
   0x3   :  { %35 = dma.done.wait [#allocation4], 16  }
   0x4   :  { %36 = vsyncadd [#allocation4], 4294967280 }
   0x5   :  { %24 = sfence }
   0x6   :  { %25 = vsyncpa [#allocation4], 1 }

</bundles_post_ra>
